<compile_context>
chip_gen: v7x
topology: tpu7x:2x2x1
jax: 0.10.0
libtpu: 0.0.40
codegen_flags: <defaults>
</compile_context>

<pallas_src>
import jax
import jax.numpy as jnp
from jax.experimental import pallas as pl
from jax.experimental.pallas import tpu as pltpu

_VMEM_LIMIT = 32 * 1024 * 1024          # explicit scoped-VMEM cap (safe on v5e/v6e/v7x)
_BLOCK_BYTES = 2 * 1024 * 1024          # target bytes per (bm, bk) f32 block
_MAX_PAD_FRAC = 0.08                    # allowed zero-padding overhead per axis


# ---------------------------------------------------------------------------
# Kernel 1: per-row (per (n, c)) reduction over the spatial axis.
# Accumulates sum(x) and sum(x^2) across the HW grid axis (reduction axis is
# the last grid axis; output blocks stay resident in VMEM across it).
# ---------------------------------------------------------------------------
def _stats_kernel(x_ref, s1_ref, s2_ref):
    k = pl.program_id(1)

    @pl.when(k == 0)
    def _():
        s1_ref[...] = jnp.zeros_like(s1_ref)
        s2_ref[...] = jnp.zeros_like(s2_ref)

    x = x_ref[...].astype(jnp.float32)
    s1_ref[...] += jnp.sum(x, axis=-1, keepdims=True)
    s2_ref[...] += jnp.sum(x * x, axis=-1, keepdims=True)


# ---------------------------------------------------------------------------
# Kernel 2: elementwise normalize + affine, folded into a single FMA:
#   out = x * scale + shift      (scale/shift broadcast per row)
# ---------------------------------------------------------------------------
def _norm_kernel(x_ref, scale_ref, shift_ref, o_ref):
    x = x_ref[...].astype(jnp.float32)
    o_ref[...] = (x * scale_ref[...] + shift_ref[...]).astype(o_ref.dtype)


# ---------------------------------------------------------------------------
# Block-size helpers.
# ---------------------------------------------------------------------------
def _round_up(v, m):
    return ((v + m - 1) // m) * m


def _choose_block_and_pad(dim, unit, target, max_pad_frac=_MAX_PAD_FRAC):
    """Pick (block, padded_dim).

    Returns the largest block size (multiple of `unit`, <= `target`) whose
    zero-padding overhead (padded_dim - dim) stays within `max_pad_frac`,
    always falling back to the minimal (unit-aligned) padding.  Keeping blocks
    large matters far more than a few percent of padded work: 128-wide blocks
    run at ~29% of the HBM roofline vs ~85% for >=512-wide blocks.
    """
    minimal = _round_up(dim, unit)
    target = max(unit, min(minimal, (target // unit) * unit))
    budget = int(max_pad_frac * dim)
    for cand in range(target, unit - 1, -unit):
        padded = _round_up(dim, cand)
        if (padded - dim) <= budget or padded == minimal:
            return cand, padded
    return unit, minimal


# ---------------------------------------------------------------------------
# Forward pass of SwitchNorm2d.  Returns (out, new_running_mean, new_running_var).
# ---------------------------------------------------------------------------
def switch_norm_2d(x, weight, bias, mean_weight, var_weight,
                   running_mean, running_var, *, eps=1e-5, momentum=0.9,
                   training=True, using_moving_average=True, using_bn=True):
    N, C, H, W = x.shape
    NC, HW = N * C, H * W
    x2d = x.reshape(NC, HW)

    # Choose block sizes first (big, lane-dense tiles), then pad the slab so
    # blocks divide it exactly.  Zero padding is neutral for sum / sum-of-
    # squares; padded rows/cols of the normalized output are sliced away.
    bm, NCp = _choose_block_and_pad(NC, 8, 256)
    bk_target = max(512, _BLOCK_BYTES // (4 * bm))
    bk, HWp = _choose_block_and_pad(HW, 128, bk_target)

    if (NCp, HWp) != (NC, HW):
        x2d = jnp.pad(x2d, ((0, NCp - NC), (0, HWp - HW)))

    grid = (NCp // bm, HWp // bk)

    s1, s2 = pl.pallas_call(
        _stats_kernel,
        out_shape=(jax.ShapeDtypeStruct((NCp, 1), jnp.float32),
                   jax.ShapeDtypeStruct((NCp, 1), jnp.float32)),
        grid=grid,
        in_specs=[pl.BlockSpec((bm, bk), lambda i, k: (i, k))],
        out_specs=(pl.BlockSpec((bm, 1), lambda i, k: (i, 0)),
                   pl.BlockSpec((bm, 1), lambda i, k: (i, 0))),
        compiler_params=pltpu.CompilerParams(
            dimension_semantics=("parallel", "arbitrary"),
            vmem_limit_bytes=_VMEM_LIMIT),
    )(x2d)

    # ----- tiny (N, C) stat mixing: plain-JAX glue, mirrors the module math --
    s1 = s1[:NC].reshape(N, C).astype(jnp.float32)
    s2 = s2[:NC].reshape(N, C).astype(jnp.float32)
    hw = jnp.float32(HW)

    mean_in = s1 / hw                                          # (N, C)
    if HW > 1:
        # torch.Tensor.var default is unbiased (divide by HW - 1).
        # TODO(synk): E[x^2]-E[x]^2 in fp32 can lose precision when |mean|>>std.
        var_in = (s2 - s1 * s1 / hw) / (hw - 1.0)              # (N, C)
    else:
        var_in = jnp.zeros_like(mean_in)
    mean_ln = jnp.mean(mean_in, axis=1, keepdims=True)         # (N, 1)
    temp = var_in + mean_in ** 2
    var_ln = jnp.mean(temp, axis=1, keepdims=True) - mean_ln ** 2

    new_running_mean, new_running_var = running_mean, running_var
    if using_bn:
        if training:
            mean_bn = jnp.mean(mean_in, axis=0, keepdims=True)     # (1, C)
            var_bn = jnp.mean(temp, axis=0, keepdims=True) - mean_bn ** 2
            if using_moving_average:
                new_running_mean = running_mean * momentum + \
                    (1.0 - momentum) * mean_bn.reshape(1, C, 1)
                new_running_var = running_var * momentum + \
                    (1.0 - momentum) * var_bn.reshape(1, C, 1)
            else:
                new_running_mean = running_mean + mean_bn.reshape(1, C, 1)
                new_running_var = running_var + \
                    (mean_bn ** 2 + var_bn).reshape(1, C, 1)
        else:
            mean_bn = running_mean.reshape(1, C).astype(jnp.float32)
            var_bn = running_var.reshape(1, C).astype(jnp.float32)

    mw = jax.nn.softmax(mean_weight.astype(jnp.float32), axis=0)
    vw = jax.nn.softmax(var_weight.astype(jnp.float32), axis=0)
    if using_bn:
        mean = mw[0] * mean_in + mw[1] * mean_ln + mw[2] * mean_bn   # (N, C)
        var = vw[0] * var_in + vw[1] * var_ln + vw[2] * var_bn       # (N, C)
    else:
        mean = mw[0] * mean_in + mw[1] * mean_ln
        var = vw[0] * var_in + vw[1] * var_ln

    # Fold mean/var/weight/bias into per-row scale & shift:
    #   out = (x - mean) * rsqrt(var + eps) * gamma + beta = x*scale + shift
    gamma = weight.reshape(1, C).astype(jnp.float32)
    beta = bias.reshape(1, C).astype(jnp.float32)
    inv_std = jax.lax.rsqrt(var + jnp.float32(eps))                  # (N, C)
    scale = (gamma * inv_std).astype(jnp.float32)                    # (N, C)
    shift = beta - mean * scale                                      # (N, C)

    scale2d = scale.reshape(NC, 1)
    shift2d = shift.reshape(NC, 1)
    if NCp != NC:
        scale2d = jnp.pad(scale2d, ((0, NCp - NC), (0, 0)))
        shift2d = jnp.pad(shift2d, ((0, NCp - NC), (0, 0)))

    out2d = pl.pallas_call(
        _norm_kernel,
        out_shape=jax.ShapeDtypeStruct((NCp, HWp), x.dtype),
        grid=grid,
        in_specs=[pl.BlockSpec((bm, bk), lambda i, k: (i, k)),
                  pl.BlockSpec((bm, 1), lambda i, k: (i, 0)),
                  pl.BlockSpec((bm, 1), lambda i, k: (i, 0))],
        out_specs=pl.BlockSpec((bm, bk), lambda i, k: (i, k)),
        compiler_params=pltpu.CompilerParams(
            dimension_semantics=("parallel", "parallel"),
            vmem_limit_bytes=_VMEM_LIMIT),
    )(x2d, scale2d, shift2d)

    out = out2d[:NC, :HW].reshape(N, C, H, W)
    return out, new_running_mean, new_running_var


# ---------------------------------------------------------------------------
# Pure-JAX reference (direct transliteration of SwitchNorm2d.forward) for check.
# ---------------------------------------------------------------------------
def _reference(x, weight, bias, mean_weight, var_weight, eps):
    N, C, H, W = x.shape
    xf = x.astype(jnp.float32).reshape(N, C, -1)
    mean_in = xf.mean(-1, keepdims=True)
    var_in = xf.var(-1, keepdims=True, ddof=1)
    mean_ln = mean_in.mean(1, keepdims=True)
    temp = var_in + mean_in ** 2
    var_ln = temp.mean(1, keepdims=True) - mean_ln ** 2
    mean_bn = mean_in.mean(0, keepdims=True)
    var_bn = temp.mean(0, keepdims=True) - mean_bn ** 2
    mw = jax.nn.softmax(mean_weight, axis=0)
    vw = jax.nn.softmax(var_weight, axis=0)
    mean = mw[0] * mean_in + mw[1] * mean_ln + mw[2] * mean_bn
    var = vw[0] * var_in + vw[1] * var_ln + vw[2] * var_bn
    x_hat = (xf - mean) / jnp.sqrt(var + eps)
    x_hat = x_hat.reshape(N, C, H, W)
    return x_hat * weight + bias


if __name__ == "__main__":
    N, C, H, W = 2, 4, 16, 16
    key = jax.random.PRNGKey(0)
    x = jax.random.normal(key, (N, C, H, W), dtype=jnp.float32) * 2.0 + 0.5

    # Parameters, initialized exactly as SwitchNorm2d.reset_parameters
    # (last_gamma=False): weight=1, bias=0, mean_weight=var_weight=ones(3),
    # running_mean = running_var = zeros.
    weight = jnp.ones((1, C, 1, 1), dtype=jnp.float32)
    bias = jnp.zeros((1, C, 1, 1), dtype=jnp.float32)
    mean_weight = jnp.ones((3,), dtype=jnp.float32)
    var_weight = jnp.ones((3,), dtype=jnp.float32)
    running_mean = jnp.zeros((1, C, 1), dtype=jnp.float32)
    running_var = jnp.zeros((1, C, 1), dtype=jnp.float32)

    out, new_rm, new_rv = switch_norm_2d(
        x, weight, bias, mean_weight, var_weight, running_mean, running_var,
        eps=1e-5, momentum=0.9, training=True)
    out = jax.block_until_ready(out)

    ref = _reference(x, weight, bias, mean_weight, var_weight, 1e-5)
    assert out.shape == (N, C, H, W)
    assert jnp.max(jnp.abs(out - ref)) < 1e-4, "mismatch vs reference"

    print("KERNEL_OK")
</pallas_src>

<mosaic_0001>
module attributes {stable_mosaic.version = 11 : i64} {
  func.func @_stats_kernel(%arg0: i32, %arg1: i32, %arg2: memref<8x256xf32, #tpu.memory_space<vmem>>, %arg3: memref<8x1xf32, #tpu.memory_space<vmem>>, %arg4: memref<8x1xf32, #tpu.memory_space<vmem>>) attributes {dimension_semantics = [#tpu.dimension_semantics<parallel>, #tpu.dimension_semantics<arbitrary>], iteration_bounds = array<i64: 1, 1>, scalar_prefetch = 0 : i64, scratch_operands = 0 : i64, tpu.core_type = #tpu.core_type<tc>, window_params = [{transform_indices = @transform_0, window_bounds = array<i64: 8, 256>}, {transform_indices = @transform_1, window_bounds = array<i64: 8, 1>}, {transform_indices = @transform_2, window_bounds = array<i64: 8, 1>}]} {
    %c0_i32 = arith.constant 0 : i32
    %0 = arith.cmpi eq, %arg1, %c0_i32 : i32
    %1 = arith.extui %0 : i1 to i32
    %c0_i32_0 = arith.constant 0 : i32
    %2 = arith.cmpi ne, %1, %c0_i32_0 : i32
    scf.if %2 {
      %cst_11 = arith.constant 0.000000e+00 : f32
      %15 = vector.broadcast %cst_11 : f32 to vector<8x1xf32>
      %c0_12 = arith.constant 0 : index
      %c0_13 = arith.constant 0 : index
      %16 = vector.load %arg3[%c0_12, %c0_13] : memref<8x1xf32, #tpu.memory_space<vmem>>, vector<8x1xf32>
      tpu.vector_store %arg3[%c0_12, %c0_13], %15 {strides = array<i32>} : memref<8x1xf32, #tpu.memory_space<vmem>>, vector<8x1xf32>,
      %cst_14 = arith.constant 0.000000e+00 : f32
      %17 = vector.broadcast %cst_14 : f32 to vector<8x1xf32>
      %c0_15 = arith.constant 0 : index
      %c0_16 = arith.constant 0 : index
      %18 = vector.load %arg4[%c0_15, %c0_16] : memref<8x1xf32, #tpu.memory_space<vmem>>, vector<8x1xf32>
      tpu.vector_store %arg4[%c0_15, %c0_16], %17 {strides = array<i32>} : memref<8x1xf32, #tpu.memory_space<vmem>>, vector<8x1xf32>,
    } else {
    }
    %c0 = arith.constant 0 : index
    %c0_1 = arith.constant 0 : index
    %3 = vector.load %arg2[%c0, %c0_1] : memref<8x256xf32, #tpu.memory_space<vmem>>, vector<8x256xf32>
    %c0_2 = arith.constant 0 : index
    %c0_3 = arith.constant 0 : index
    %4 = vector.load %arg3[%c0_2, %c0_3] : memref<8x1xf32, #tpu.memory_space<vmem>>, vector<8x1xf32>
    %cst = arith.constant dense<0.000000e+00> : vector<8xf32>
    %5 = vector.multi_reduction <add>, %3, %cst [1] : vector<8x256xf32> to vector<8xf32>
    %6 = vector.shape_cast %5 : vector<8xf32> to vector<8x1xf32>
    %7 = arith.addf %4, %6 : vector<8x1xf32>
    %c0_4 = arith.constant 0 : index
    %c0_5 = arith.constant 0 : index
    %8 = vector.load %arg3[%c0_4, %c0_5] : memref<8x1xf32, #tpu.memory_space<vmem>>, vector<8x1xf32>
    tpu.vector_store %arg3[%c0_4, %c0_5], %7 {strides = array<i32>} : memref<8x1xf32, #tpu.memory_space<vmem>>, vector<8x1xf32>,
    %c0_6 = arith.constant 0 : index
    %c0_7 = arith.constant 0 : index
    %9 = vector.load %arg4[%c0_6, %c0_7] : memref<8x1xf32, #tpu.memory_space<vmem>>, vector<8x1xf32>
    %10 = arith.mulf %3, %3 : vector<8x256xf32>
    %cst_8 = arith.constant dense<0.000000e+00> : vector<8xf32>
    %11 = vector.multi_reduction <add>, %10, %cst_8 [1] : vector<8x256xf32> to vector<8xf32>
    %12 = vector.shape_cast %11 : vector<8xf32> to vector<8x1xf32>
    %13 = arith.addf %9, %12 : vector<8x1xf32>
    %c0_9 = arith.constant 0 : index
    %c0_10 = arith.constant 0 : index
    %14 = vector.load %arg4[%c0_9, %c0_10] : memref<8x1xf32, #tpu.memory_space<vmem>>, vector<8x1xf32>
    tpu.vector_store %arg4[%c0_9, %c0_10], %13 {strides = array<i32>} : memref<8x1xf32, #tpu.memory_space<vmem>>, vector<8x1xf32>,
    return
  }
  func.func @transform_0(%arg0: i32, %arg1: i32) -> (i32, i32) {
    %c0_i32 = arith.constant 0 : i32
    return %arg0, %arg1 : i32, i32
  }
  func.func @transform_1(%arg0: i32, %arg1: i32) -> (i32, i32) {
    %c0_i32 = arith.constant 0 : i32
    %c0_i32_0 = arith.constant 0 : i32
    return %arg0, %c0_i32 : i32, i32
  }
  func.func @transform_2(%arg0: i32, %arg1: i32) -> (i32, i32) {
    %c0_i32 = arith.constant 0 : i32
    %c0_i32_0 = arith.constant 0 : i32
    return %arg0, %c0_i32 : i32, i32
  }
}

</mosaic_0001>

<bundles_post_ra>
// kernel: tpu_custom_call.1
= control target key start
LH: loop header
LB: loop body
LE: loop exit
PB: predicated region body
PF: predicated region fallthrough
CT: control target
= control target key end

     0   :  { %8 = vsyncpa [#allocation3], 0  ;;  %s81_s9 = smov [#allocation2]   ;;  %s132_s0 = inlined_call_operand.hbm [shape: f32[8,256], index: 0, kind: input, shape index: {}]   ;;  %s133_s1 = inlined_call_operand.vmem [shape: f32[8,1], index: 1, kind: output, shape index: {0}]   ;;  %s134_s2 = inlined_call_operand.vmem [shape: f32[8,1], index: 2, kind: output, shape index: {1}]  }
   0x1   :  { %s15_s10 = sshll.u32 %s81_s9, 4  ;;  %s57_s13 = scalar_lea.hbm %s132_s0, 256  ;;  %s16_s10 = int_to_ptr.vmem [resolvable:$true] %s15_s10 }
   0x2   :  { %p58_p0 = scmp.ne.s32.totalorder %s132_s0, %s57_s13  ;;  %p61_p1 = scmp.lt.u32.totalorder %s57_s13, %s132_s0 }
   0x4   :  { %p63_p2 = pnand %p61_p1, %p58_p0 }
   0x6   :  { %66 = shalt.err (!%p63_p2)
}
   0x7   :  { %s67_s18 = scalar_lea.vmem %s16_s10, 256  ;;  %p72_p4 = scmp.lt.s32.totalorder %s16_s10, %s16_s10 }
   0x8   :  { %p68_p3 = scmp.ne.s32.totalorder %s16_s10, %s67_s18  ;;  %p73_p5 = scmp.lt.s32.totalorder %s67_s18, %s67_s18 }
   0xa   :  { %p74_p6 = por %p73_p5, %p72_p4 }
   0xc   :  { %p75_p7 = pnand %p74_p6, %p68_p3 }
   0xe   :  { %78 = shalt.err (!%p75_p7)
}
   0xf   :  { %18 = dma.hbm_to_vmem [thread:$0]  %s132_s0, 256, %s16_s10, [#allocation3]  }
  0x10   :  { %79 = dma.done.wait [#allocation3], 256  }
  0x11   :  { %80 = vsyncadd [#allocation3], 4294967040  ;;  %vm26_vm0 = vcmask 7168   ;;  %v82_v0 = vmov 0.0   ;;  %v29_v1 = vld [vmem:[#allocation2] sm:$0xff]  ;;  %v30_v2 = vld [vmem:[#allocation2 + $0x8] sm:$0xff] }
  0x12   :  { %27 = vst.msk [vmem:[%s133_s1] sm:$0xff] %vm26_vm0, %v82_v0  ;;  %28 = vst.msk [vmem:[%s134_s2] sm:$0xff] %vm26_vm0, %v82_v0  ;;  %v32_v3 = vadd.f32 %v30_v2, %v29_v1  ;;  %v39_v4 = vmul.f32 %v29_v1, %v29_v1  ;;  %v40_v5 = vmul.f32 %v30_v2, %v30_v2 }
  0x14   :  { %33 = vadd.xlane.f32.xlu0 %v32_v3  ;;  %v41_v6 = vadd.f32 %v40_v5, %v39_v4 }
  0x18   :  { %42 = vadd.xlane.f32.xlu0 %v41_v6 }
  0x19   :  { %v31_v7 = vld [vmem:[%s133_s1] sm:$0xff] }
  0x1a   :  { %v38_v10 = vld [vmem:[%s134_s2] sm:$0xff] }
  0xa1   :  { %v34_v8 = vpop.xlane.xlu0 %33 }
  0xa2   :  { %v35_v9 = vadd.f32 %v34_v8, %v31_v7 }
  0xa4   :  { %37 = vst.msk [vmem:[%s133_s1] sm:$0xff] %vm26_vm0, %v35_v9 }
  0xa5   :  { %v43_v11 = vpop.xlane.xlu0 %42 }
  0xa6   :  { %v44_v12 = vadd.f32 %v43_v11, %v38_v10 }
  0xa8   :  { %45 = vst.msk [vmem:[%s134_s2] sm:$0xff] %vm26_vm0, %v44_v12 }
  0xa9   :  { %54 = vsyncpa [#allocation3], 1 }

</bundles_post_ra>
